<compile_context>
chip_gen: v7x
topology: tpu7x:2x2x1
jax: 0.10.0
libtpu: 0.0.40
codegen_flags: <defaults>
</compile_context>

<pallas_src>
import jax
import jax.numpy as jnp
from jax import lax
from jax.experimental import pallas as pl
from jax.experimental.pallas import tpu as pltpu

INPUT_SIZE = 10
HIDDEN_SIZE = 32
OUTPUT_SIZE = 1

# Conservative in-flight VMEM bytes per batch element of a tile (f32 worst case):
#   x block (tile_b, 10) f32, lane-padded to 128 lanes, double-buffered  ~2*512
#   layer-1 (tile_b, 32) f32 activations (lane-padded)                   ~2*512
#   lane-dense (32, tile_b) activations for layers 2-3                   ~3*128
#   (1, tile_b) output row (double-buffered) + slack                     ~ 128
_VMEM_BYTES_PER_ROW = 2816
_VMEM_FIXED_BYTES = 4 * 1024 * 1024        # params + compiler internal scratch
_VMEM_TILE_BUDGET_FRACTION = 0.5           # of physical VMEM, spent on the tile
_VMEM_LIMIT_FRACTION = 0.85                # scoped-VMEM cap requested


def _round_up(n, m):
    return ((n + m - 1) // m) * m


def _vmem_capacity_bytes():
    try:
        return int(pltpu.get_tpu_info().vmem_capacity_bytes)
    except Exception:
        return 64 * 1024 * 1024            # assume smallest (v7x per-TC VMEM)


def _pick_tile_b(batch, requested):
    """Largest batch tile that fits the per-generation VMEM budget."""
    cap = _vmem_capacity_bytes()
    budget_rows = int(cap * _VMEM_TILE_BUDGET_FRACTION) // _VMEM_BYTES_PER_ROW
    tile = min(requested, max(512, budget_rows))
    # Keep >= 2 grid steps at large batch so dimension_semantics=("parallel",)
    # can shard batch tiles across both TensorCores on v7x.
    if batch > 1024:
        tile = min(tile, _round_up(pl.cdiv(batch, 2), 512))
    tile = min(tile, _round_up(batch, 128))
    tile = max(128, (tile // 128) * 128)
    vmem_limit = int(cap * _VMEM_LIMIT_FRACTION)
    return tile, vmem_limit


def mlp_kernel(x_ref, w1_ref, b1_ref, w2t_ref, b2_ref, w3_ref, b3_ref, o_ref):
    """One batch tile of the fused MLP."""
    cdt = w1_ref.dtype                       # MXU compute dtype (bf16 or f32)
    x = x_ref[...].astype(cdt)               # (tile_b, 10) — cast in-kernel

    # Layer 1 + bias + ReLU: (tile_b,10) @ (10,H) -> (tile_b,H), f32 accumulate.
    g1 = jnp.dot(x, w1_ref[...], preferred_element_type=jnp.float32)
    h1 = jnp.maximum(g1 + b1_ref[...], 0.0)                     # (tile_b, H) f32

    # Layer 2 + bias + ReLU: contract minor dims (A @ B^T / "NT" form) so the
    # result comes out already transposed as lane-dense (H, tile_b).
    g2 = lax.dot_general(w2t_ref[...], h1.astype(cdt),
                         dimension_numbers=(((1,), (1,)), ((), ())),
                         preferred_element_type=jnp.float32)    # (H, tile_b)
    h2 = jnp.maximum(g2 + b2_ref[...], 0.0)                     # (H, tile_b) f32

    # Layer 3 (out_features == 1): VPU multiply + sublane reduce -> lane-dense
    # (1, tile_b) row instead of a width-1 MXU matmul / masked (tile_b,1) store.
    out = jnp.sum(h2 * w3_ref[...], axis=0, keepdims=True) + b3_ref[...]
    o_ref[...] = out.astype(o_ref.dtype)


def simple_mlp(x, w1, b1, w2, b2, w3, b3, *, tile_b=32768,
               mxu_dtype=jnp.bfloat16):
    """Forward pass of SimplePyTorchModel as one fused Pallas TPU kernel.

    x: (batch, 10), consumed directly in its natural layout (contiguous HBM DMA
    per batch tile; no wrapper transpose / extra HBM pass). Weights are stored
    (in, out); biases (1, out) — numerically identical to PyTorch's
    y = x @ W.T + b with its (out, in) weights. `mxu_dtype` is the in-kernel
    cast applied to MXU operands only (f32 accumulation is always kept).
    Returns (batch, 1) float32.
    """
    batch = x.shape[0]
    tile, vmem_limit = _pick_tile_b(batch, tile_b)
    b_pad = _round_up(batch, tile)
    if b_pad != batch:                 # pad only a ragged tail tile (else no-op)
        x = jnp.pad(x, ((0, b_pad - batch), (0, 0)))
    grid = (b_pad // tile,)

    f32 = jnp.float32
    w1c = w1.astype(mxu_dtype)                              # (10, H)
    w2t = jnp.transpose(w2).astype(mxu_dtype)               # (H, H) == W2 (out, in)
    b1r = b1.reshape(1, HIDDEN_SIZE).astype(f32)            # (1, H)
    b2c = b2.reshape(HIDDEN_SIZE, 1).astype(f32)            # (H, 1)
    w3c = w3.reshape(HIDDEN_SIZE, 1).astype(f32)            # (H, 1)
    b3c = b3.reshape(1, 1).astype(f32)                      # (1, 1)

    const = lambda i: (0, 0)     # resident params: DMA'd once, kept in VMEM

    outT = pl.pallas_call(
        mlp_kernel,
        out_shape=jax.ShapeDtypeStruct((OUTPUT_SIZE, b_pad), f32),
        grid=grid,
        in_specs=[
            pl.BlockSpec((tile, INPUT_SIZE), lambda i: (i, 0)),   # batch-tiled x
            pl.BlockSpec((INPUT_SIZE, HIDDEN_SIZE), const),       # w1
            pl.BlockSpec((1, HIDDEN_SIZE), const),                # b1
            pl.BlockSpec((HIDDEN_SIZE, HIDDEN_SIZE), const),      # w2^T
            pl.BlockSpec((HIDDEN_SIZE, 1), const),                # b2
            pl.BlockSpec((HIDDEN_SIZE, 1), const),                # w3
            pl.BlockSpec((1, 1), const),                          # b3
        ],
        out_specs=pl.BlockSpec((OUTPUT_SIZE, tile), lambda i: (0, i)),
        compiler_params=pltpu.CompilerParams(
            dimension_semantics=("parallel",),      # shard batch tiles on v7x
            vmem_limit_bytes=vmem_limit),
    )(x, w1c, b1r, w2t, b2c, w3c, b3c)

    return outT[0, :batch].reshape(batch, OUTPUT_SIZE)


def init_params(key):
    """Deterministic parameter init mirroring nn.Linear shapes.

    PyTorch Linear weights are (out, in); we store the transpose (in, out)
    so the math is x @ W + b (identical to PyTorch's x @ W_pt.T + b).
    """
    k1, k2, k3, k4, k5, k6 = jax.random.split(key, 6)
    s1 = 1.0 / jnp.sqrt(INPUT_SIZE)
    s2 = 1.0 / jnp.sqrt(HIDDEN_SIZE)
    w1 = jax.random.uniform(k1, (INPUT_SIZE, HIDDEN_SIZE), jnp.float32, -s1, s1)
    b1 = jax.random.uniform(k2, (1, HIDDEN_SIZE), jnp.float32, -s1, s1)
    w2 = jax.random.uniform(k3, (HIDDEN_SIZE, HIDDEN_SIZE), jnp.float32, -s2, s2)
    b2 = jax.random.uniform(k4, (1, HIDDEN_SIZE), jnp.float32, -s2, s2)
    w3 = jax.random.uniform(k5, (HIDDEN_SIZE, OUTPUT_SIZE), jnp.float32, -s2, s2)
    b3 = jax.random.uniform(k6, (1, OUTPUT_SIZE), jnp.float32, -s2, s2)
    return w1, b1, w2, b2, w3, b3


if __name__ == "__main__":
    key = jax.random.PRNGKey(0)
    kx1, kx2, kp = jax.random.split(key, 3)
    params = init_params(kp)
    w1, b1, w2, b2, w3, b3 = params

    def ref_fn(x):
        h = jnp.maximum(x @ w1 + b1, 0.0)
        h = jnp.maximum(h @ w2 + b2, 0.0)
        return h @ w3 + b3

    # Small batch, f32 MXU path: single grid step with a padded tail tile.
    x_small = jax.random.normal(kx1, (8, INPUT_SIZE), jnp.float32)
    out_small = jax.block_until_ready(
        simple_mlp(x_small, *params, mxu_dtype=jnp.float32))
    assert out_small.shape == (8, OUTPUT_SIZE)
    assert jnp.allclose(out_small, ref_fn(x_small), atol=1e-4, rtol=1e-4)

    # Multi-tile grid: 3 batch tiles of 128 with a ragged (padded) tail.
    x_big = jax.random.normal(kx2, (300, INPUT_SIZE), jnp.float32)
    out_big = jax.block_until_ready(
        simple_mlp(x_big, *params, tile_b=128, mxu_dtype=jnp.float32))
    assert out_big.shape == (300, OUTPUT_SIZE)
    assert jnp.allclose(out_big, ref_fn(x_big), atol=1e-4, rtol=1e-4)

    # Default perf path (bf16 MXU operands, f32 accumulation): looser tolerance.
    out_bf16 = jax.block_until_ready(simple_mlp(x_big, *params, tile_b=128))
    assert out_bf16.shape == (300, OUTPUT_SIZE)
    assert jnp.allclose(out_bf16, ref_fn(x_big), atol=1e-1, rtol=1e-1)

    print("KERNEL_OK")
</pallas_src>

<mosaic_0001>
module attributes {stable_mosaic.version = 11 : i64} {
  func.func @mlp_kernel(%arg0: i32, %arg1: memref<128x10xf32, #tpu.memory_space<vmem>>, %arg2: memref<10x32xf32, #tpu.memory_space<vmem>>, %arg3: memref<1x32xf32, #tpu.memory_space<vmem>>, %arg4: memref<32x32xf32, #tpu.memory_space<vmem>>, %arg5: memref<32x1xf32, #tpu.memory_space<vmem>>, %arg6: memref<32x1xf32, #tpu.memory_space<vmem>>, %arg7: memref<1x1xf32, #tpu.memory_space<vmem>>, %arg8: memref<1x128xf32, #tpu.memory_space<vmem>>) attributes {dimension_semantics = [#tpu.dimension_semantics<parallel>], iteration_bounds = array<i64: 1>, scalar_prefetch = 0 : i64, scratch_operands = 0 : i64, tpu.core_type = #tpu.core_type<tc>, window_params = [{transform_indices = @transform_0, window_bounds = array<i64: 128, 10>}, {pipeline_mode = #tpu.pipeline_mode<synchronous>, transform_indices = @transform_1, window_bounds = array<i64: 10, 32>}, {pipeline_mode = #tpu.pipeline_mode<synchronous>, transform_indices = @transform_2, window_bounds = array<i64: 1, 32>}, {pipeline_mode = #tpu.pipeline_mode<synchronous>, transform_indices = @transform_3, window_bounds = array<i64: 32, 32>}, {pipeline_mode = #tpu.pipeline_mode<synchronous>, transform_indices = @transform_4, window_bounds = array<i64: 32, 1>}, {pipeline_mode = #tpu.pipeline_mode<synchronous>, transform_indices = @transform_5, window_bounds = array<i64: 32, 1>}, {pipeline_mode = #tpu.pipeline_mode<synchronous>, transform_indices = @transform_6, window_bounds = array<i64: 1, 1>}, {transform_indices = @transform_7, window_bounds = array<i64: 1, 128>}]} {
    %c0 = arith.constant 0 : index
    %c0_0 = arith.constant 0 : index
    %0 = vector.load %arg1[%c0, %c0_0] : memref<128x10xf32, #tpu.memory_space<vmem>>, vector<128x10xf32>
    %c0_1 = arith.constant 0 : index
    %c0_2 = arith.constant 0 : index
    %1 = vector.load %arg2[%c0_1, %c0_2] : memref<10x32xf32, #tpu.memory_space<vmem>>, vector<10x32xf32>
    %cst = arith.constant dense<0.000000e+00> : vector<128x32xf32>
    %2 = tpu.matmul %0, %1, %cst {dimension_numbers = #tpu.dot_dimension_numbers<[1], [0], [0], [1], [0, 0, 1, 1], [], []>} : vector<128x10xf32>, vector<10x32xf32>, vector<128x32xf32> -> vector<128x32xf32>
    %c0_3 = arith.constant 0 : index
    %c0_4 = arith.constant 0 : index
    %3 = vector.load %arg3[%c0_3, %c0_4] : memref<1x32xf32, #tpu.memory_space<vmem>>, vector<1x32xf32>
    %4 = vector.broadcast %3 : vector<1x32xf32> to vector<128x32xf32>
    %5 = arith.addf %2, %4 : vector<128x32xf32>
    %cst_5 = arith.constant 0.000000e+00 : f32
    %6 = vector.broadcast %cst_5 : f32 to vector<128x32xf32>
    %7 = arith.maximumf %5, %6 : vector<128x32xf32>
    %c0_6 = arith.constant 0 : index
    %c0_7 = arith.constant 0 : index
    %8 = vector.load %arg4[%c0_6, %c0_7] : memref<32x32xf32, #tpu.memory_space<vmem>>, vector<32x32xf32>
    %cst_8 = arith.constant dense<0.000000e+00> : vector<32x128xf32>
    %9 = tpu.matmul %8, %7, %cst_8 {dimension_numbers = #tpu.dot_dimension_numbers<[1], [1], [0], [0], [0, 0, 1, 0], [], []>} : vector<32x32xf32>, vector<128x32xf32>, vector<32x128xf32> -> vector<32x128xf32>
    %c0_9 = arith.constant 0 : index
    %c0_10 = arith.constant 0 : index
    %10 = vector.load %arg5[%c0_9, %c0_10] : memref<32x1xf32, #tpu.memory_space<vmem>>, vector<32x1xf32>
    %11 = vector.broadcast %10 : vector<32x1xf32> to vector<32x128xf32>
    %12 = arith.addf %9, %11 : vector<32x128xf32>
    %cst_11 = arith.constant 0.000000e+00 : f32
    %13 = vector.broadcast %cst_11 : f32 to vector<32x128xf32>
    %14 = arith.maximumf %12, %13 : vector<32x128xf32>
    %c0_12 = arith.constant 0 : index
    %c0_13 = arith.constant 0 : index
    %15 = vector.load %arg6[%c0_12, %c0_13] : memref<32x1xf32, #tpu.memory_space<vmem>>, vector<32x1xf32>
    %16 = vector.broadcast %15 : vector<32x1xf32> to vector<32x128xf32>
    %17 = arith.mulf %14, %16 : vector<32x128xf32>
    %cst_14 = arith.constant dense<0.000000e+00> : vector<128xf32>
    %18 = vector.multi_reduction <add>, %17, %cst_14 [0] : vector<32x128xf32> to vector<128xf32>
    %19 = vector.shape_cast %18 : vector<128xf32> to vector<1x128xf32>
    %c0_15 = arith.constant 0 : index
    %c0_16 = arith.constant 0 : index
    %20 = vector.load %arg7[%c0_15, %c0_16] : memref<1x1xf32, #tpu.memory_space<vmem>>, vector<1x1xf32>
    %21 = vector.broadcast %20 : vector<1x1xf32> to vector<1x128xf32>
    %22 = arith.addf %19, %21 : vector<1x128xf32>
    %c0_17 = arith.constant 0 : index
    %c0_18 = arith.constant 0 : index
    %23 = vector.load %arg8[%c0_17, %c0_18] : memref<1x128xf32, #tpu.memory_space<vmem>>, vector<1x128xf32>
    tpu.vector_store %arg8[%c0_17, %c0_18], %22 {strides = array<i32>} : memref<1x128xf32, #tpu.memory_space<vmem>>, vector<1x128xf32>,
    return
  }
  func.func @transform_0(%arg0: i32) -> (i32, i32) {
    %c0_i32 = arith.constant 0 : i32
    %c0_i32_0 = arith.constant 0 : i32
    return %arg0, %c0_i32 : i32, i32
  }
  func.func @transform_1(%arg0: i32) -> (i32, i32) {
    %c0_i32 = arith.constant 0 : i32
    %c0_i32_0 = arith.constant 0 : i32
    %c0_i32_1 = arith.constant 0 : i32
    return %c0_i32, %c0_i32_0 : i32, i32
  }
  func.func @transform_2(%arg0: i32) -> (i32, i32) {
    %c0_i32 = arith.constant 0 : i32
    %c0_i32_0 = arith.constant 0 : i32
    %c0_i32_1 = arith.constant 0 : i32
    return %c0_i32, %c0_i32_0 : i32, i32
  }
  func.func @transform_3(%arg0: i32) -> (i32, i32) {
    %c0_i32 = arith.constant 0 : i32
    %c0_i32_0 = arith.constant 0 : i32
    %c0_i32_1 = arith.constant 0 : i32
    return %c0_i32, %c0_i32_0 : i32, i32
  }
  func.func @transform_4(%arg0: i32) -> (i32, i32) {
    %c0_i32 = arith.constant 0 : i32
    %c0_i32_0 = arith.constant 0 : i32
    %c0_i32_1 = arith.constant 0 : i32
    return %c0_i32, %c0_i32_0 : i32, i32
  }
  func.func @transform_5(%arg0: i32) -> (i32, i32) {
    %c0_i32 = arith.constant 0 : i32
    %c0_i32_0 = arith.constant 0 : i32
    %c0_i32_1 = arith.constant 0 : i32
    return %c0_i32, %c0_i32_0 : i32, i32
  }
  func.func @transform_6(%arg0: i32) -> (i32, i32) {
    %c0_i32 = arith.constant 0 : i32
    %c0_i32_0 = arith.constant 0 : i32
    %c0_i32_1 = arith.constant 0 : i32
    return %c0_i32, %c0_i32_0 : i32, i32
  }
  func.func @transform_7(%arg0: i32) -> (i32, i32) {
    %c0_i32 = arith.constant 0 : i32
    %c0_i32_0 = arith.constant 0 : i32
    return %c0_i32, %arg0 : i32, i32
  }
}

</mosaic_0001>

<bundles_post_ra>
// kernel: tpu_custom_call.1
= control target key start
LH: loop header
LB: loop body
LE: loop exit
PB: predicated region body
PF: predicated region fallthrough
CT: control target
= control target key end

     0   :  { %s943_s0 = inlined_call_operand.vmem [shape: f32[128,10], index: 0, kind: input, shape index: {}]   ;;  %s944_s1 = inlined_call_operand.vmem [shape: f32[10,32], index: 1, kind: input, shape index: {}]   ;;  %s945_s2 = inlined_call_operand.vmem [shape: f32[1,32], index: 2, kind: input, shape index: {}]   ;;  %s946_s3 = inlined_call_operand.vmem [shape: f32[32,32], index: 3, kind: input, shape index: {}]   ;;  %s947_s4 = inlined_call_operand.vmem [shape: f32[32,1], index: 4, kind: input, shape index: {}]   ;;  %s948_s5 = inlined_call_operand.vmem [shape: f32[32,1], index: 5, kind: input, shape index: {}]   ;;  %s949_s6 = inlined_call_operand.<no memory space> [shape: f32[1,1], index: 6, kind: input, shape index: {}]   ;;  %s950_s7 = inlined_call_operand.hbm [shape: f32[1,128], index: 7, kind: output, shape index: {}]  }
   0x1   :  { %v12_v0 = vstv %s949_s6 }
   0x2   :  { %13 = vst [vmem:[#allocation2] sm:$0x1] %v12_v0 }
   0x3   :  { %v45_v1 = vld [vmem:[%s944_s1] sm:$0xff]  ;;  %v46_v2 = vld [vmem:[%s944_s1 + $0x8] sm:$0x3]  ;;  %vm103_vm0 = vcmask 1041408   ;;  %vm734_vm1 = vmmov 1   ;;  %vm54_vm3 = vcmask 80896  }
   0x4   :  { %v29_v3 = vld [vmem:[%s943_s0] sm:$0xff]  ;;  %v651_v4 = vpack.c.bf16 %v46_v2, %v45_v1  ;;  %vm652_vm2 = vmpackc.low %vm103_vm0, %vm734_vm1  ;;  %v30_v5 = vld [vmem:[%s943_s0 + $0x8] sm:$0xff] }
   0x5   :  { %589 = vmatprep.mubr.msk.f32.mxu0 %vm54_vm3, %v29_v3  ;;  %v31_v6 = vld [vmem:[%s943_s0 + $0x10] sm:$0xff] }
   0x6   :  { %653 = vmatprep.subr.msk.bf16.mxu0 %vm652_vm2, %v651_v4 }
   0x7   :  { %656 = vmatpush3.bf16.msk.msra.mxu0 %vm652_vm2, %v651_v4 }
   0x8   :  { %14 = vsyncpa [#allocation4], 0  ;;  %v32_v7 = vld [vmem:[%s943_s0 + $0x18] sm:$0xff]  ;;  %v33_v8 = vld [vmem:[%s943_s0 + $0x20] sm:$0xff]  ;;  %vm296_vm4 = vcmask 261120   ;;  %v735_v23 = vmov 0  }
   0x9   :  { %v34_v9 = vld [vmem:[%s943_s0 + $0x28] sm:$0xff]  ;;  %v35_v10 = vld [vmem:[%s943_s0 + $0x30] sm:$0xff]  ;;  %v36_v11 = vld [vmem:[%s943_s0 + $0x38] sm:$0xff]  ;;  %708 = vset.pattern.permute.xlu0 %v735_v23  ;;  %709 = vset.pattern.permute.xlu1 %v735_v23 }
   0xa   :  { %590 = vmatmul.mubr.msk.f32.vlgmr.msra.gmra.mrb[0].mxu0 %vm54_vm3, %v30_v5  ;;  %v37_v12 = vld [vmem:[%s943_s0 + $0x40] sm:$0xff]  ;;  %v38_v13 = vld [vmem:[%s943_s0 + $0x48] sm:$0xff]  ;;  %v39_v14 = vld [vmem:[%s943_s0 + $0x50] sm:$0xff] }
   0xb   :  { %592 = vmatprep.mubr.msk.f32.mxu0 %vm54_vm3, %v31_v6  ;;  %v40_v15 = vld [vmem:[%s943_s0 + $0x58] sm:$0xff]  ;;  %v41_v16 = vld [vmem:[%s943_s0 + $0x60] sm:$0xff]  ;;  %v42_v17 = vld [vmem:[%s943_s0 + $0x68] sm:$0xff] }
   0xc   :  { %v43_v18 = vld [vmem:[%s943_s0 + $0x70] sm:$0xff]  ;;  %v44_v19 = vld [vmem:[%s943_s0 + $0x78] sm:$0xff]  ;;  %v268_v20 = vld [vmem:[%s946_s3] sm:$0xff] }
   0xd   :  { %645 = vmatprep.mubr.msk.f32.mxu1 %vm296_vm4, %v268_v20  ;;  %v272_v21 = vld [vmem:[%s947_s4] sm:$0xff]  ;;  %v274_v22 = vld [vmem:[%s947_s4 + $0x10] sm:$0xff]  ;;  %v273_v24 = vld [vmem:[%s947_s4 + $0x8] sm:$0xff] }
   0xe   :  { %593 = vmatmul.mubr.msk.f32.gmra.mrb[2].mxu0 %vm54_vm3, %v32_v7  ;;  %278 = vperm.xlu0 %708, %v272_v21   ;;  %v275_v25 = vld [vmem:[%s947_s4 + $0x18] sm:$0xff]  ;;  %v446_v26 = vld [vmem:[%s948_s5] sm:$0xff]  ;;  %v447_v27 = vld [vmem:[%s948_s5 + $0x8] sm:$0xff] }
   0xf   :  { %595 = vmatprep.mubr.msk.f32.mxu0 %vm54_vm3, %v33_v8  ;;  %288 = vperm.xlu1 %709, %v274_v22   ;;  %v448_v28 = vld [vmem:[%s948_s5 + $0x10] sm:$0xff]  ;;  %v449_v29 = vld [vmem:[%s948_s5 + $0x18] sm:$0xff]  ;;  %v483_v30 = vld [vmem:[#allocation2] sm:$0x1] }
  0x10   :  { %v509_v31 = vld [vmem:[%s945_s2] ss:$0 sm:$0xff]  ;;  %vm883_vm5 = vmpackc.low %vm296_vm4, %vm296_vm4 }
  0x12   :  { %596 = vmatmul.mubr.msk.f32.gmra.mrb[4].mxu0 %vm54_vm3, %v34_v9  ;;  %283 = vperm.xlu0 %708, %v273_v24  }
  0x13   :  { %598 = vmatprep.mubr.msk.f32.mxu0 %vm54_vm3, %v35_v10  ;;  %293 = vperm.xlu1 %709, %v275_v25   ;;  %v269_v25 = vld [vmem:[%s946_s3 + $0x8] sm:$0xff] }
  0x16   :  { %599 = vmatmul.mubr.msk.f32.gmra.mrb[6].mxu0 %vm54_vm3, %v36_v11  ;;  %452 = vperm.xlu0 %708, %v446_v26   ;;  %v270_v26 = vld [vmem:[%s946_s3 + $0x10] sm:$0xff] }
  0x17   :  { %601 = vmatprep.mubr.msk.f32.mxu0 %vm54_vm3, %v37_v12  ;;  %457 = vperm.xlu1 %709, %v447_v27   ;;  %v271_v27 = vld [vmem:[%s946_s3 + $0x18] sm:$0xff]  ;;  %s736_s3 = smov [#allocation3]  }
  0x18   :  { %s501_s10 = sshll.u32 %s736_s3, 4  ;;  %s502_s10 = int_to_ptr.vmem [resolvable:$true] %s501_s10 }
  0x19   :  { %s710_s11 = scalar_lea.vmem %s502_s10, 16  ;;  %s714_s1 = scalar_lea.vmem %s502_s10, 32 }
  0x1a   :  { %602 = vmatmul.mubr.msk.f32.gmra.mrb[8].mxu0 %vm54_vm3, %v38_v13  ;;  %462 = vperm.xlu0 %708, %v448_v28   ;;  %p711_p0 = scmp.ne.s32.totalorder %s502_s10, %s710_s11  ;;  %p715_p1 = scmp.lt.s32.totalorder %s502_s10, %s502_s10 }
  0x1b   :  { %604 = vmatprep.mubr.msk.f32.mxu0 %vm54_vm3, %v39_v14  ;;  %467 = vperm.xlu1 %709, %v449_v29   ;;  %p716_p2 = scmp.lt.s32.totalorder %s714_s1, %s710_s11 }
  0x1d   :  { %p717_p3 = por %p716_p2, %p715_p1 }
  0x1e   :  { %605 = vmatmul.mubr.msk.f32.gmra.mrb[10].mxu0 %vm54_vm3, %v40_v15  ;;  %486 = vperm.xlu0 %708, %v483_v30  }
  0x1f   :  { %607 = vmatprep.mubr.msk.f32.mxu0 %vm54_vm3, %v41_v16  ;;  %p718_p4 = pnand %p717_p3, %p711_p0 }
  0x22   :  { %608 = vmatmul.mubr.msk.f32.gmra.mrb[12].mxu0 %vm54_vm3, %v42_v17 }
  0x23   :  { %610 = vmatprep.mubr.msk.f32.mxu0 %vm54_vm3, %v43_v18 }
  0x26   :  { %611 = vmatmul.mubr.msk.f32.gmra.mrb[14].mxu0 %vm54_vm3, %v44_v19 }
  0x8d   :  { %v279_v28 = vpop.permute.xlu0 %278 }
  0x8e   :  { %v289_v29 = vpop.permute.xlu1 %288 }
  0x91   :  { %v284_v30 = vpop.permute.xlu0 %283 }
  0xdd   :  { %v591_v32 = vpop.f32.mrb[0].mxu0 }
  0xde   :  { %v179_v33 = vadd.f32 %v591_v32, %v509_v31  ;;  %v173_v34 = vpop.f32.mrb[1].mxu0 }
  0xdf   :  { %v174_v35 = vadd.f32 %v509_v31, %v173_v34 }
  0xe0   :  { %v253_v36 = vmax.f32 %v179_v33, 0.0 }
  0xe1   :  { %v252_v37 = vmax.f32 %v174_v35, 0.0  ;;  %v594_v38 = vpop.f32.mrb[2].mxu0 }
  0xe2   :  { %v189_v39 = vadd.f32 %v594_v38, %v509_v31  ;;  %v183_v40 = vpop.f32.mrb[3].mxu0 }
  0xe3   :  { %v184_v42 = vadd.f32 %v509_v31, %v183_v40  ;;  %v657_v43 = vpack.c.bf16 %v253_v36, %v252_v37  ;;  %v453_v36 = vpop.permute.xlu0 %452 }
  0xe4   :  { %v255_v44 = vmax.f32 %v189_v39, 0.0 }
  0xe5   :  { %v254_v45 = vmax.f32 %v184_v42, 0.0  ;;  %659 = vmatprep.subr.msk.bf16.mxu1 %vm883_vm5, %v657_v43  ;;  %v597_v46 = vpop.f32.mrb[4].mxu0 }
  0xe6   :  { %662 = vmatpush3.bf16.xpose.msk.msra.mxu1 %vm883_vm5, %v657_v43  ;;  %v199_v47 = vadd.f32 %v597_v46, %v509_v31  ;;  %v193_v48 = vpop.f32.mrb[5].mxu0 }
  0xe7   :  { %v663_v49 = vpack.c.bf16 %v255_v44, %v254_v45  ;;  %v194_v50 = vadd.f32 %v509_v31, %v193_v48 }
  0xe8   :  { %v257_v51 = vmax.f32 %v199_v47, 0.0 }
  0xe9   :  { %665 = vmatprep.subr.msk.bf16.mxu1 %vm883_vm5, %v663_v49  ;;  %v256_v52 = vmax.f32 %v194_v50, 0.0  ;;  %v600_v53 = vpop.f32.mrb[6].mxu0 }
  0xea   :  { %v209_v54 = vadd.f32 %v600_v53, %v509_v31  ;;  %v203_v55 = vpop.f32.mrb[7].mxu0 }
  0xeb   :  { %v669_v56 = vpack.c.bf16 %v257_v51, %v256_v52  ;;  %v204_v57 = vadd.f32 %v509_v31, %v203_v55 }
  0xec   :  { %v259_v58 = vmax.f32 %v209_v54, 0.0  ;;  %v489_v54 = vlaneseq }
  0xed   :  { %v258_v59 = vmax.f32 %v204_v57, 0.0  ;;  %v603_v60 = vpop.f32.mrb[8].mxu0 }
  0xee   :  { %668 = vmatpush3.bf16.xpose.msk.msra.mxu1 %vm883_vm5, %v663_v49  ;;  %v219_v61 = vadd.f32 %v603_v60, %v509_v31  ;;  %v213_v62 = vpop.f32.mrb[9].mxu0  ;;  %v463_v49 = vpop.permute.xlu0 %462  ;;  %v490_v57 = vshrl.u32 %v489_v54, 7 }
  0xef   :  { %671 = vmatprep.subr.msk.bf16.mxu1 %vm883_vm5, %v669_v56  ;;  %v675_v63 = vpack.c.bf16 %v259_v58, %v258_v59  ;;  %v214_v0 = vadd.f32 %v509_v31, %v213_v62 }
  0xf0   :  { %v261_v1 = vmax.f32 %v219_v61, 0.0  ;;  %v491_v60 = vsub.s32 0, %v490_v57 }
  0xf1   :  { %v260_v2 = vmax.f32 %v214_v0, 0.0  ;;  %v606_v3 = vpop.f32.mrb[10].mxu0 }
  0xf2   :  { %v229_v4 = vadd.f32 %v606_v3, %v509_v31  ;;  %v223_v5 = vpop.f32.mrb[11].mxu0  ;;  %v487_v62 = vpop.permute.xlu0 %486 }
  0xf3   :  { %v681_v6 = vpack.c.bf16 %v261_v1, %v260_v2  ;;  %v224_v7 = vadd.f32 %v509_v31, %v223_v5  ;;  %v492_v0 = vrot.slane %v487_v62, %v491_v60 }
  0xf4   :  { %v263_v8 = vmax.f32 %v229_v4, 0.0 }
  0xf5   :  { %v262_v9 = vmax.f32 %v224_v7, 0.0  ;;  %v609_v10 = vpop.f32.mrb[12].mxu0 }
  0xf6   :  { %674 = vmatpush3.bf16.xpose.msk.msra.mxu1 %vm883_vm5, %v669_v56  ;;  %v239_v11 = vadd.f32 %v609_v10, %v509_v31  ;;  %v233_v12 = vpop.f32.mrb[13].mxu0 }
  0xf7   :  { %677 = vmatprep.subr.msk.bf16.mxu1 %vm883_vm5, %v675_v63  ;;  %v687_v13 = vpack.c.bf16 %v263_v8, %v262_v9  ;;  %v234_v14 = vadd.f32 %v509_v31, %v233_v12 }
  0xf8   :  { %v265_v15 = vmax.f32 %v239_v11, 0.0 }
  0xf9   :  { %v264_v16 = vmax.f32 %v234_v14, 0.0  ;;  %v612_v17 = vpop.f32.mrb[14].mxu0 }
  0xfa   :  { %v249_v18 = vadd.f32 %v612_v17, %v509_v31  ;;  %v243_v19 = vpop.f32.mrb[15].mxu0 }
  0xfb   :  { %v693_v20 = vpack.c.bf16 %v265_v15, %v264_v16  ;;  %v244_v21 = vadd.f32 %v509_v31, %v243_v19  ;;  %v294_v31 = vpop.permute.xlu1 %293 }
  0xfc   :  { %v267_v22 = vmax.f32 %v249_v18, 0.0 }
  0xfd   :  { %v266_v23 = vmax.f32 %v244_v21, 0.0 }
  0xfe   :  { %680 = vmatpush3.bf16.xpose.msk.msra.mxu1 %vm883_vm5, %v675_v63 }
  0xff   :  { %683 = vmatprep.subr.msk.bf16.mxu1 %vm883_vm5, %v681_v6  ;;  %v699_v24 = vpack.c.bf16 %v267_v22, %v266_v23  ;;  %v458_v38 = vpop.permute.xlu1 %457 }
 0x103   :  { %v468_v51 = vpop.permute.xlu1 %467 }
 0x106   :  { %686 = vmatpush3.bf16.xpose.msk.msra.mxu1 %vm883_vm5, %v681_v6 }
 0x107   :  { %689 = vmatprep.subr.msk.bf16.mxu1 %vm883_vm5, %v687_v13 }
 0x10e   :  { %692 = vmatpush3.bf16.xpose.msk.msra.mxu1 %vm883_vm5, %v687_v13 }
 0x10f   :  { %695 = vmatprep.subr.msk.bf16.mxu1 %vm883_vm5, %v693_v20 }
 0x116   :  { %698 = vmatpush3.bf16.xpose.msk.msra.mxu1 %vm883_vm5, %v693_v20 }
 0x117   :  { %701 = vmatprep.subr.msk.bf16.mxu1 %vm883_vm5, %v699_v24 }
 0x11e   :  { %704 = vmatpush3.bf16.xpose.msk.msra.mxu1 %vm883_vm5, %v699_v24 }
 0x125   :  { %646 = vmatmul.mubr.msk.f32.vlgmr.msra.gmra.mrb[0].mxu1 %vm296_vm4, %v269_v25 }
 0x126   :  { %648 = vmatprep.mubr.msk.f32.mxu1 %vm296_vm4, %v270_v26 }
 0x129   :  { %649 = vmatmul.mubr.msk.f32.gmra.mrb[2].mxu1 %vm296_vm4, %v271_v27 }
 0x1f8   :  { %v647_v32 = vpop.f32.mrb[0].mxu1 }
 0x1f9   :  { %v429_v33 = vadd.f32 %v647_v32, %v284_v30  ;;  %v423_v34 = vpop.f32.mrb[1].mxu1 }
 0x1fa   :  { %v424_v35 = vadd.f32 %v423_v34, %v279_v28 }
 0x1fb   :  { %v443_v37 = vmax.f32 %v429_v33, 0.0 }
 0x1fc   :  { %v442_v39 = vmax.f32 %v424_v35, 0.0  ;;  %v650_v40 = vpop.f32.mrb[2].mxu1 }
 0x1fd   :  { %v471_v41 = vmul.f32 %v458_v38, %v443_v37  ;;  %v439_v42 = vadd.f32 %v650_v40, %v294_v31  ;;  %v433_v43 = vpop.f32.mrb[3].mxu1 }
 0x1fe   :  { %v470_v44 = vmul.f32 %v453_v36, %v442_v39  ;;  %v434_v45 = vadd.f32 %v433_v43, %v289_v29 }
 0x1ff   :  { %v445_v47 = vmax.f32 %v439_v42, 0.0 }
 0x200   :  { %v474_v46 = vadd.f32 %v471_v41, %v470_v44  ;;  %v444_v48 = vmax.f32 %v434_v45, 0.0 }
 0x201   :  { %v473_v52 = vmul.f32 %v468_v51, %v445_v47 }
 0x202   :  { %v472_v50 = vmul.f32 %v463_v49, %v444_v48 }
 0x204   :  { %v475_v53 = vadd.f32 %v474_v46, %v472_v50 }
 0x206   :  { %v476_v55 = vadd.f32 %v475_v53, %v473_v52 }
 0x208   :  { %v477_v56 = vrot.slane %v476_v55, 4 }
 0x20a   :  { %v478_v58 = vadd.f32 %v477_v56, %v476_v55 }
 0x20c   :  { %v479_v59 = vrot.slane %v478_v58, 2 }
 0x20e   :  { %v480_v61 = vadd.f32 %v479_v59, %v478_v58 }
 0x210   :  { %v481_v63 = vrot.slane %v480_v61, 1 }
 0x212   :  { %v482_v1 = vadd.f32 %v481_v63, %v480_v61 }
 0x214   :  { %v493_v2 = vadd.f32 %v492_v0, %v482_v1 }
 0x216   :  { %494 = vst [vmem:[#allocation3] sm:$0x1] %v493_v2 }
 0x217   :  { %721 = shalt.err (!%p718_p4)
}
 0x218   :  { %s722_s14 = scalar_lea.hbm %s950_s7, 16 }
 0x219   :  { %p723_p5 = scmp.ne.s32.totalorder %s950_s7, %s722_s14  ;;  %p726_p6 = scmp.lt.u32.totalorder %s722_s14, %s950_s7 }
 0x21b   :  { %p728_p7 = pnand %p726_p6, %p723_p5 }
 0x21d   :  { %731 = shalt.err (!%p728_p7)
}
 0x21e   :  { %504 = dma.vmem_to_hbm [thread:$0]  %s502_s10, 16, %s950_s7, [#allocation4]  }
 0x21f   :  { %732 = dma.done.wait [#allocation4], 16  }
 0x220   :  { %733 = vsyncadd [#allocation4], 4294967280 }
 0x221   :  { %508 = vsyncpa [#allocation4], 1 }

</bundles_post_ra>
